<compile_context>
chip_gen: v7x
topology: tpu7x:2x2x1
jax: 0.10.0
libtpu: 0.0.40
codegen_flags: <defaults>
</compile_context>

<pallas_src>
import functools

import jax
import jax.numpy as jnp
from jax.experimental import pallas as pl
from jax.experimental.pallas import tpu as pltpu


# ---------------------------------------------------------------------------
# One-time (import-time) hardware / feature probes.
# ---------------------------------------------------------------------------

def _vmem_capacity_bytes():
    try:
        return int(pltpu.get_tpu_info().vmem_capacity_bytes)
    except Exception:
        return 64 * 1024 * 1024        # conservative fallback: v7x per-TensorCore VMEM


_VMEM_CAP = _vmem_capacity_bytes()


def _probe_buffered_weights():
    """Decide ONCE whether this JAX build supports pl.Buffered(1) weight blocks."""
    if not hasattr(pl, "Buffered"):
        return False
    try:
        spec = pl.BlockSpec((8, 128), lambda i: (0, 0),
                            pipeline_mode=pl.Buffered(buffer_count=1))

        def _copy(x_ref, o_ref):
            o_ref[...] = x_ref[...]

        fn = pl.pallas_call(
            _copy,
            out_shape=jax.ShapeDtypeStruct((8, 128), jnp.float32),
            grid=(1,),
            in_specs=[spec],
            out_specs=pl.BlockSpec((8, 128), lambda i: (0, 0)),
        )
        jax.jit(fn).lower(jax.ShapeDtypeStruct((8, 128), jnp.float32))
        return True
    except Exception:
        return False


_BUFFERED_WEIGHTS = _probe_buffered_weights()


# ---------------------------------------------------------------------------
# Kernel.
# ---------------------------------------------------------------------------

def _codeposterior_kernel(x_ref,
                          wp_ref, bp_ref,
                          w1a_ref, b1a_ref, w2a_ref, b2a_ref,
                          w1b_ref, b1b_ref, w2b_ref, b2b_ref,
                          wc_ref,
                          out_ref):
    # Projection (1x1 conv == Linear with bias): bf16 MXU inputs, f32 accumulation.
    x = x_ref[...].astype(wp_ref.dtype)
    h = jnp.dot(x, wp_ref[...], preferred_element_type=jnp.float32) + bp_ref[...]

    def mlp_block(h, w1, b1, w2, b2):
        z = jnp.dot(h.astype(w1.dtype), w1,
                    preferred_element_type=jnp.float32) + b1
        z = jnp.where(z > 0, z, 0.2 * z)                   # LeakyReLU(0.2)
        return jnp.dot(z.astype(w2.dtype), w2,
                       preferred_element_type=jnp.float32) + b2

    h = mlp_block(h, w1a_ref[...], b1a_ref[...], w2a_ref[...], b2a_ref[...])
    h = mlp_block(h, w1b_ref[...], b1b_ref[...], w2b_ref[...], b2b_ref[...])

    # classifier: Linear(d_model, dc, bias=False); bf16 writeback (lane-dense).
    out_ref[...] = jnp.dot(h.astype(wc_ref.dtype), wc_ref[...],
                           preferred_element_type=jnp.float32
                           ).astype(out_ref.dtype)


# ---------------------------------------------------------------------------
# Host-side helpers (all shape logic is static under jit).
# ---------------------------------------------------------------------------

def _round_up(n, m):
    return ((n + m - 1) // m) * m


def _pad2d(a, rows, cols, dtype):
    r, c = a.shape
    return jnp.pad(a, ((0, rows - r), (0, cols - c))).astype(dtype)


def _choose_tm(n_rows):
    # Bigger tiles where VMEM allows (v5e/v6e: 128 MiB); 256 otherwise (v7x: 64 MiB).
    tm = 512 if _VMEM_CAP >= 96 * 1024 * 1024 else 256
    tm = min(tm, n_rows)                       # n_rows is 8-aligned -> tm stays 8-aligned
    # Guarantee >= 2 steps on the "parallel" row axis when possible (v7x megacore).
    if n_rows >= 16 and pl.cdiv(n_rows, tm) < 2:
        tm = _round_up(pl.cdiv(n_rows, 2), 8)
    return max(tm, 8)


def _vmem_limit_bytes(weight_bytes, tm, dx, dm_p, dh_p, dc_p):
    w_vmem = weight_bytes * (1 if _BUFFERED_WEIGHTS else 2)   # single vs double buffered
    io_vmem = 2 * tm * (dx * 4 + dc_p * 2)                    # double-buffered x / out tiles
    scratch = tm * (6 * dh_p + 12 * dm_p + 4 * dc_p)          # in-kernel f32+bf16 intermediates
    need = w_vmem + io_vmem + scratch + (16 << 20)            # headroom for Mosaic internals
    hi = _VMEM_CAP - (8 << 20)                                # never request all of VMEM
    return int(max(32 << 20, min(hi, need)))


def prepare_params(params):
    """Pad weight *output* dims to lane-dense multiples of 128 and cast matmul operands
    to bf16 (biases stay f32).  Done ONCE, outside the per-call path.  Zero padding is
    mathematically exact for this network (padded weights/biases are zero, LeakyReLU(0)=0)."""
    dx, d_model = params["wp"].shape
    d_hidden = params["w1a"].shape[1]
    dc = params["wc"].shape[1]
    dm_p = _round_up(d_model, 128)
    dh_p = _round_up(d_hidden, 128)
    dc_p = _round_up(dc, 128)
    return {
        "wp":  _pad2d(params["wp"],  dx,   dm_p, jnp.bfloat16),   # dx (contraction) un-padded
        "bp":  _pad2d(params["bp"],  1,    dm_p, jnp.float32),
        "w1a": _pad2d(params["w1a"], dm_p, dh_p, jnp.bfloat16),
        "b1a": _pad2d(params["b1a"], 1,    dh_p, jnp.float32),
        "w2a": _pad2d(params["w2a"], dh_p, dm_p, jnp.bfloat16),
        "b2a": _pad2d(params["b2a"], 1,    dm_p, jnp.float32),
        "w1b": _pad2d(params["w1b"], dm_p, dh_p, jnp.bfloat16),
        "b1b": _pad2d(params["b1b"], 1,    dh_p, jnp.float32),
        "w2b": _pad2d(params["w2b"], dh_p, dm_p, jnp.bfloat16),
        "b2b": _pad2d(params["b2b"], 1,    dm_p, jnp.float32),
        "wc":  _pad2d(params["wc"],  dm_p, dc_p, jnp.bfloat16),
    }


@functools.partial(jax.jit, static_argnames=("dc",))
def code_posterior_forward(x, prep, *, dc):
    """x: (B, T, dx) float32.  prep: output of prepare_params().
    Returns (logit (B, T, dc) float32, None) — discrete c_type, shared_layer=None path."""
    B, T, dx = x.shape
    N = B * T
    dm_p = prep["wp"].shape[1]
    dh_p = prep["w1a"].shape[1]
    dc_p = prep["wc"].shape[1]

    x2d = x.reshape(N, dx)                     # no copy, no pad in the common 8-aligned case
    n_rows = N
    if N % 8 != 0:                             # rare: <8 pad rows, fused inside this jit
        n_rows = _round_up(N, 8)
        x2d = jnp.pad(x2d, ((0, n_rows - N), (0, 0)))

    tm = _choose_tm(n_rows)
    grid = pl.cdiv(n_rows, tm)                 # ragged tail handled by Pallas masking

    weights = (prep["wp"], prep["bp"],
               prep["w1a"], prep["b1a"], prep["w2a"], prep["b2a"],
               prep["w1b"], prep["b1b"], prep["w2b"], prep["b2b"],
               prep["wc"])
    weight_bytes = sum(int(w.size) * w.dtype.itemsize for w in weights)

    def wspec(arr):
        # Loop-invariant weight blocks (constant index_map): fetched once either way;
        # Buffered(1) halves their VMEM footprint (matters on v7x's 64 MiB).
        if _BUFFERED_WEIGHTS:
            return pl.BlockSpec(arr.shape, lambda i: (0, 0),
                                pipeline_mode=pl.Buffered(buffer_count=1))
        return pl.BlockSpec(arr.shape, lambda i: (0, 0))

    flops = 2 * n_rows * (dx * dm_p + 2 * (dm_p * dh_p + dh_p * dm_p) + dm_p * dc_p)
    bytes_accessed = n_rows * dx * 4 + weight_bytes + n_rows * dc_p * 2

    # TODO(synk): for very large d_model (>~1.4k on v7x) fully-resident bf16 weights
    # exceed 64 MiB VMEM; a hidden-dim (3*d_model) streaming path with an f32 VMEM
    # accumulator would be needed — not implemented, compile fails loudly instead.
    out_p = pl.pallas_call(
        _codeposterior_kernel,
        out_shape=jax.ShapeDtypeStruct((n_rows, dc_p), jnp.bfloat16),
        grid_spec=pltpu.PrefetchScalarGridSpec(
            num_scalar_prefetch=0,
            grid=(grid,),
            in_specs=[pl.BlockSpec((tm, dx), lambda i: (i, 0))]    # row tiles of x (f32)
                     + [wspec(w) for w in weights],                # VMEM-resident weights
            out_specs=pl.BlockSpec((tm, dc_p), lambda i: (i, 0)),  # lane-dense bf16 out
        ),
        compiler_params=pltpu.CompilerParams(
            dimension_semantics=("parallel",),                     # megacore row axis
            vmem_limit_bytes=_vmem_limit_bytes(weight_bytes, tm, dx, dm_p, dh_p, dc_p)),
        cost_estimate=pl.CostEstimate(flops=int(flops), transcendentals=0,
                                      bytes_accessed=int(bytes_accessed)),
    )(x2d, *weights)

    logit = out_p[:N, :dc].astype(jnp.float32).reshape(B, T, dc)
    return logit, None


# ---------------------------------------------------------------------------
# Parameter init + pure-JAX reference (for the self-test).
# ---------------------------------------------------------------------------

def init_params(key, dx, d_model, dc):
    ks = jax.random.split(key, 12)
    s = lambda k, shape, fan_in: (jax.random.normal(k, shape, jnp.float32)
                                  / jnp.sqrt(jnp.float32(fan_in)))
    return {
        # fC_projection: Conv1by1(dx -> d_model), with bias
        "wp":  s(ks[0], (dx, d_model), dx),
        "bp":  s(ks[1], (1, d_model), d_model),
        # MLP block 0: Linear(d_model, 3*d_model), Linear(3*d_model, d_model)
        "w1a": s(ks[2], (d_model, 3 * d_model), d_model),
        "b1a": s(ks[3], (1, 3 * d_model), 3 * d_model),
        "w2a": s(ks[4], (3 * d_model, d_model), 3 * d_model),
        "b2a": s(ks[5], (1, d_model), d_model),
        # MLP block 1
        "w1b": s(ks[6], (d_model, 3 * d_model), d_model),
        "b1b": s(ks[7], (1, 3 * d_model), 3 * d_model),
        "w2b": s(ks[8], (3 * d_model, d_model), 3 * d_model),
        "b2b": s(ks[9], (1, d_model), d_model),
        # classifier: Linear(d_model, dc, bias=False)
        "wc":  s(ks[10], (d_model, dc), d_model),
    }


def _reference(x, p):
    # pure-JAX f32 reference of the same forward pass
    h = x @ p["wp"] + p["bp"]
    for a in ("a", "b"):
        z = h @ p["w1" + a] + p["b1" + a]
        z = jnp.where(z > 0, z, 0.2 * z)
        h = z @ p["w2" + a] + p["b2" + a]
    return h @ p["wc"]


if __name__ == "__main__":
    # small shapes: batch=2, seq=8, dx=4, d_model=32, dc=6
    B, T, dx, d_model, dc = 2, 8, 4, 32, 6
    key = jax.random.PRNGKey(0)
    kx, kp = jax.random.split(key)
    x = jax.random.normal(kx, (B, T, dx), jnp.float32)
    params = init_params(kp, dx, d_model, dc)
    prep = prepare_params(params)            # one-time weight pad/cast (out of hot path)

    logit, log_var = code_posterior_forward(x, prep, dc=dc)
    logit = jax.block_until_ready(logit)
    assert log_var is None
    assert logit.shape == (B, T, dc)

    # bf16 MXU inputs / bf16 writeback (f32 accumulation) -> compare against the
    # f32 reference with a correspondingly looser, documented tolerance.
    ref = _reference(x.reshape(B * T, dx), params).reshape(B, T, dc)
    assert jnp.allclose(logit, ref, atol=5e-2, rtol=5e-2), (
        float(jnp.max(jnp.abs(logit - ref))))

    # TODO(synk): 'continuous' c_type (code_mu / code_logvar heads) and the
    # shared_layer branch are not exercised here; only the discrete path is kernelized.
    print("KERNEL_OK")
</pallas_src>

<mosaic_0001>
module attributes {stable_mosaic.version = 11 : i64} {
  func.func @_codeposterior_kernel(%arg0: i32, %arg1: memref<8x4xf32, #tpu.memory_space<vmem>>, %arg2: memref<4x128xbf16, #tpu.memory_space<vmem>>, %arg3: memref<1x128xf32, #tpu.memory_space<vmem>>, %arg4: memref<128x128xbf16, #tpu.memory_space<vmem>>, %arg5: memref<1x128xf32, #tpu.memory_space<vmem>>, %arg6: memref<128x128xbf16, #tpu.memory_space<vmem>>, %arg7: memref<1x128xf32, #tpu.memory_space<vmem>>, %arg8: memref<128x128xbf16, #tpu.memory_space<vmem>>, %arg9: memref<1x128xf32, #tpu.memory_space<vmem>>, %arg10: memref<128x128xbf16, #tpu.memory_space<vmem>>, %arg11: memref<1x128xf32, #tpu.memory_space<vmem>>, %arg12: memref<128x128xbf16, #tpu.memory_space<vmem>>, %arg13: memref<8x128xbf16, #tpu.memory_space<vmem>>) attributes {dimension_semantics = [#tpu.dimension_semantics<parallel>], iteration_bounds = array<i64: 2>, scalar_prefetch = 0 : i64, scratch_operands = 0 : i64, tpu.core_type = #tpu.core_type<tc>, window_params = [{transform_indices = @transform_0, window_bounds = array<i64: 8, 4>}, {pipeline_mode = #tpu.pipeline_mode<synchronous>, transform_indices = @transform_1, window_bounds = array<i64: 4, 128>}, {pipeline_mode = #tpu.pipeline_mode<synchronous>, transform_indices = @transform_2, window_bounds = array<i64: 1, 128>}, {pipeline_mode = #tpu.pipeline_mode<synchronous>, transform_indices = @transform_3, window_bounds = array<i64: 128, 128>}, {pipeline_mode = #tpu.pipeline_mode<synchronous>, transform_indices = @transform_4, window_bounds = array<i64: 1, 128>}, {pipeline_mode = #tpu.pipeline_mode<synchronous>, transform_indices = @transform_5, window_bounds = array<i64: 128, 128>}, {pipeline_mode = #tpu.pipeline_mode<synchronous>, transform_indices = @transform_6, window_bounds = array<i64: 1, 128>}, {pipeline_mode = #tpu.pipeline_mode<synchronous>, transform_indices = @transform_7, window_bounds = array<i64: 128, 128>}, {pipeline_mode = #tpu.pipeline_mode<synchronous>, transform_indices = @transform_8, window_bounds = array<i64: 1, 128>}, {pipeline_mode = #tpu.pipeline_mode<synchronous>, transform_indices = @transform_9, window_bounds = array<i64: 128, 128>}, {pipeline_mode = #tpu.pipeline_mode<synchronous>, transform_indices = @transform_10, window_bounds = array<i64: 1, 128>}, {pipeline_mode = #tpu.pipeline_mode<synchronous>, transform_indices = @transform_11, window_bounds = array<i64: 128, 128>}, {transform_indices = @transform_12, window_bounds = array<i64: 8, 128>}]} {
    %c0 = arith.constant 0 : index
    %c0_0 = arith.constant 0 : index
    %0 = vector.load %arg1[%c0, %c0_0] : memref<8x4xf32, #tpu.memory_space<vmem>>, vector<8x4xf32>
    %1 = arith.truncf %0 : vector<8x4xf32> to vector<8x4xbf16>
    %c0_1 = arith.constant 0 : index
    %c0_2 = arith.constant 0 : index
    %2 = vector.load %arg2[%c0_1, %c0_2] : memref<4x128xbf16, #tpu.memory_space<vmem>>, vector<4x128xbf16>
    %cst = arith.constant dense<0.000000e+00> : vector<8x128xf32>
    %3 = tpu.matmul %1, %2, %cst {dimension_numbers = #tpu.dot_dimension_numbers<[1], [0], [0], [1], [0, 0, 1, 1], [], []>} : vector<8x4xbf16>, vector<4x128xbf16>, vector<8x128xf32> -> vector<8x128xf32>
    %c0_3 = arith.constant 0 : index
    %c0_4 = arith.constant 0 : index
    %4 = vector.load %arg3[%c0_3, %c0_4] : memref<1x128xf32, #tpu.memory_space<vmem>>, vector<1x128xf32>
    %5 = vector.broadcast %4 : vector<1x128xf32> to vector<8x128xf32>
    %6 = arith.addf %3, %5 : vector<8x128xf32>
    %c0_5 = arith.constant 0 : index
    %c0_6 = arith.constant 0 : index
    %7 = vector.load %arg4[%c0_5, %c0_6] : memref<128x128xbf16, #tpu.memory_space<vmem>>, vector<128x128xbf16>
    %c0_7 = arith.constant 0 : index
    %c0_8 = arith.constant 0 : index
    %8 = vector.load %arg5[%c0_7, %c0_8] : memref<1x128xf32, #tpu.memory_space<vmem>>, vector<1x128xf32>
    %c0_9 = arith.constant 0 : index
    %c0_10 = arith.constant 0 : index
    %9 = vector.load %arg6[%c0_9, %c0_10] : memref<128x128xbf16, #tpu.memory_space<vmem>>, vector<128x128xbf16>
    %c0_11 = arith.constant 0 : index
    %c0_12 = arith.constant 0 : index
    %10 = vector.load %arg7[%c0_11, %c0_12] : memref<1x128xf32, #tpu.memory_space<vmem>>, vector<1x128xf32>
    %11 = arith.truncf %6 : vector<8x128xf32> to vector<8x128xbf16>
    %cst_13 = arith.constant dense<0.000000e+00> : vector<8x128xf32>
    %12 = tpu.matmul %11, %7, %cst_13 {dimension_numbers = #tpu.dot_dimension_numbers<[1], [0], [0], [1], [0, 0, 1, 1], [], []>} : vector<8x128xbf16>, vector<128x128xbf16>, vector<8x128xf32> -> vector<8x128xf32>
    %13 = vector.broadcast %8 : vector<1x128xf32> to vector<8x128xf32>
    %14 = arith.addf %12, %13 : vector<8x128xf32>
    %cst_14 = arith.constant 0.000000e+00 : f32
    %15 = vector.broadcast %cst_14 : f32 to vector<8x128xf32>
    %16 = arith.cmpf ogt, %14, %15 : vector<8x128xf32>
    %cst_15 = arith.constant 2.000000e-01 : f32
    %17 = vector.broadcast %cst_15 : f32 to vector<8x128xf32>
    %18 = arith.mulf %17, %14 : vector<8x128xf32>
    %19 = arith.select %16, %14, %18 : vector<8x128xi1>, vector<8x128xf32>
    %20 = arith.truncf %19 : vector<8x128xf32> to vector<8x128xbf16>
    %cst_16 = arith.constant dense<0.000000e+00> : vector<8x128xf32>
    %21 = tpu.matmul %20, %9, %cst_16 {dimension_numbers = #tpu.dot_dimension_numbers<[1], [0], [0], [1], [0, 0, 1, 1], [], []>} : vector<8x128xbf16>, vector<128x128xbf16>, vector<8x128xf32> -> vector<8x128xf32>
    %22 = vector.broadcast %10 : vector<1x128xf32> to vector<8x128xf32>
    %23 = arith.addf %21, %22 : vector<8x128xf32>
    %c0_17 = arith.constant 0 : index
    %c0_18 = arith.constant 0 : index
    %24 = vector.load %arg8[%c0_17, %c0_18] : memref<128x128xbf16, #tpu.memory_space<vmem>>, vector<128x128xbf16>
    %c0_19 = arith.constant 0 : index
    %c0_20 = arith.constant 0 : index
    %25 = vector.load %arg9[%c0_19, %c0_20] : memref<1x128xf32, #tpu.memory_space<vmem>>, vector<1x128xf32>
    %c0_21 = arith.constant 0 : index
    %c0_22 = arith.constant 0 : index
    %26 = vector.load %arg10[%c0_21, %c0_22] : memref<128x128xbf16, #tpu.memory_space<vmem>>, vector<128x128xbf16>
    %c0_23 = arith.constant 0 : index
    %c0_24 = arith.constant 0 : index
    %27 = vector.load %arg11[%c0_23, %c0_24] : memref<1x128xf32, #tpu.memory_space<vmem>>, vector<1x128xf32>
    %28 = arith.truncf %23 : vector<8x128xf32> to vector<8x128xbf16>
    %cst_25 = arith.constant dense<0.000000e+00> : vector<8x128xf32>
    %29 = tpu.matmul %28, %24, %cst_25 {dimension_numbers = #tpu.dot_dimension_numbers<[1], [0], [0], [1], [0, 0, 1, 1], [], []>} : vector<8x128xbf16>, vector<128x128xbf16>, vector<8x128xf32> -> vector<8x128xf32>
    %30 = vector.broadcast %25 : vector<1x128xf32> to vector<8x128xf32>
    %31 = arith.addf %29, %30 : vector<8x128xf32>
    %cst_26 = arith.constant 0.000000e+00 : f32
    %32 = vector.broadcast %cst_26 : f32 to vector<8x128xf32>
    %33 = arith.cmpf ogt, %31, %32 : vector<8x128xf32>
    %cst_27 = arith.constant 2.000000e-01 : f32
    %34 = vector.broadcast %cst_27 : f32 to vector<8x128xf32>
    %35 = arith.mulf %34, %31 : vector<8x128xf32>
    %36 = arith.select %33, %31, %35 : vector<8x128xi1>, vector<8x128xf32>
    %37 = arith.truncf %36 : vector<8x128xf32> to vector<8x128xbf16>
    %cst_28 = arith.constant dense<0.000000e+00> : vector<8x128xf32>
    %38 = tpu.matmul %37, %26, %cst_28 {dimension_numbers = #tpu.dot_dimension_numbers<[1], [0], [0], [1], [0, 0, 1, 1], [], []>} : vector<8x128xbf16>, vector<128x128xbf16>, vector<8x128xf32> -> vector<8x128xf32>
    %39 = vector.broadcast %27 : vector<1x128xf32> to vector<8x128xf32>
    %40 = arith.addf %38, %39 : vector<8x128xf32>
    %41 = arith.truncf %40 : vector<8x128xf32> to vector<8x128xbf16>
    %c0_29 = arith.constant 0 : index
    %c0_30 = arith.constant 0 : index
    %42 = vector.load %arg12[%c0_29, %c0_30] : memref<128x128xbf16, #tpu.memory_space<vmem>>, vector<128x128xbf16>
    %cst_31 = arith.constant dense<0.000000e+00> : vector<8x128xf32>
    %43 = tpu.matmul %41, %42, %cst_31 {dimension_numbers = #tpu.dot_dimension_numbers<[1], [0], [0], [1], [0, 0, 1, 1], [], []>} : vector<8x128xbf16>, vector<128x128xbf16>, vector<8x128xf32> -> vector<8x128xf32>
    %44 = arith.truncf %43 : vector<8x128xf32> to vector<8x128xbf16>
    %c0_32 = arith.constant 0 : index
    %c0_33 = arith.constant 0 : index
    %45 = vector.load %arg13[%c0_32, %c0_33] : memref<8x128xbf16, #tpu.memory_space<vmem>>, vector<8x128xbf16>
    tpu.vector_store %arg13[%c0_32, %c0_33], %44 {strides = array<i32>} : memref<8x128xbf16, #tpu.memory_space<vmem>>, vector<8x128xbf16>,
    return
  }
  func.func @transform_0(%arg0: i32) -> (i32, i32) {
    %c0_i32 = arith.constant 0 : i32
    %c0_i32_0 = arith.constant 0 : i32
    return %arg0, %c0_i32 : i32, i32
  }
  func.func @transform_1(%arg0: i32) -> (i32, i32) {
    %c0_i32 = arith.constant 0 : i32
    %c0_i32_0 = arith.constant 0 : i32
    %c0_i32_1 = arith.constant 0 : i32
    return %c0_i32, %c0_i32_0 : i32, i32
  }
  func.func @transform_2(%arg0: i32) -> (i32, i32) {
    %c0_i32 = arith.constant 0 : i32
    %c0_i32_0 = arith.constant 0 : i32
    %c0_i32_1 = arith.constant 0 : i32
    return %c0_i32, %c0_i32_0 : i32, i32
  }
  func.func @transform_3(%arg0: i32) -> (i32, i32) {
    %c0_i32 = arith.constant 0 : i32
    %c0_i32_0 = arith.constant 0 : i32
    %c0_i32_1 = arith.constant 0 : i32
    return %c0_i32, %c0_i32_0 : i32, i32
  }
  func.func @transform_4(%arg0: i32) -> (i32, i32) {
    %c0_i32 = arith.constant 0 : i32
    %c0_i32_0 = arith.constant 0 : i32
    %c0_i32_1 = arith.constant 0 : i32
    return %c0_i32, %c0_i32_0 : i32, i32
  }
  func.func @transform_5(%arg0: i32) -> (i32, i32) {
    %c0_i32 = arith.constant 0 : i32
    %c0_i32_0 = arith.constant 0 : i32
    %c0_i32_1 = arith.constant 0 : i32
    return %c0_i32, %c0_i32_0 : i32, i32
  }
  func.func @transform_6(%arg0: i32) -> (i32, i32) {
    %c0_i32 = arith.constant 0 : i32
    %c0_i32_0 = arith.constant 0 : i32
    %c0_i32_1 = arith.constant 0 : i32
    return %c0_i32, %c0_i32_0 : i32, i32
  }
  func.func @transform_7(%arg0: i32) -> (i32, i32) {
    %c0_i32 = arith.constant 0 : i32
    %c0_i32_0 = arith.constant 0 : i32
    %c0_i32_1 = arith.constant 0 : i32
    return %c0_i32, %c0_i32_0 : i32, i32
  }
  func.func @transform_8(%arg0: i32) -> (i32, i32) {
    %c0_i32 = arith.constant 0 : i32
    %c0_i32_0 = arith.constant 0 : i32
    %c0_i32_1 = arith.constant 0 : i32
    return %c0_i32, %c0_i32_0 : i32, i32
  }
  func.func @transform_9(%arg0: i32) -> (i32, i32) {
    %c0_i32 = arith.constant 0 : i32
    %c0_i32_0 = arith.constant 0 : i32
    %c0_i32_1 = arith.constant 0 : i32
    return %c0_i32, %c0_i32_0 : i32, i32
  }
  func.func @transform_10(%arg0: i32) -> (i32, i32) {
    %c0_i32 = arith.constant 0 : i32
    %c0_i32_0 = arith.constant 0 : i32
    %c0_i32_1 = arith.constant 0 : i32
    return %c0_i32, %c0_i32_0 : i32, i32
  }
  func.func @transform_11(%arg0: i32) -> (i32, i32) {
    %c0_i32 = arith.constant 0 : i32
    %c0_i32_0 = arith.constant 0 : i32
    %c0_i32_1 = arith.constant 0 : i32
    return %c0_i32, %c0_i32_0 : i32, i32
  }
  func.func @transform_12(%arg0: i32) -> (i32, i32) {
    %c0_i32 = arith.constant 0 : i32
    %c0_i32_0 = arith.constant 0 : i32
    return %arg0, %c0_i32 : i32, i32
  }
}

</mosaic_0001>

<bundles_post_ra>
// kernel: code_posterior_forward.1
= control target key start
LH: loop header
LB: loop body
LE: loop exit
PB: predicated region body
PF: predicated region fallthrough
CT: control target
= control target key end

     0   :  { %s2292_s0 = inlined_call_operand.vmem [shape: f32[16,4], index: 0, kind: input, shape index: {}]   ;;  %s2293_s1 = inlined_call_operand.vmem [shape: bf16[4,128], index: 1, kind: input, shape index: {}]   ;;  %s2294_s2 = inlined_call_operand.vmem [shape: f32[1,128], index: 2, kind: input, shape index: {}]   ;;  %s2295_s3 = inlined_call_operand.hbm [shape: bf16[128,128], index: 3, kind: input, shape index: {}]   ;;  %s2296_s4 = inlined_call_operand.hbm [shape: f32[1,128], index: 4, kind: input, shape index: {}]   ;;  %s2297_s5 = inlined_call_operand.hbm [shape: bf16[128,128], index: 5, kind: input, shape index: {}]   ;;  %s2298_s6 = inlined_call_operand.hbm [shape: f32[1,128], index: 6, kind: input, shape index: {}]   ;;  %s2299_s7 = inlined_call_operand.hbm [shape: bf16[128,128], index: 7, kind: input, shape index: {}]   ;;  %s2300_s8 = inlined_call_operand.hbm [shape: f32[1,128], index: 8, kind: input, shape index: {}]   ;;  %s2301_s9 = inlined_call_operand.hbm [shape: bf16[128,128], index: 9, kind: input, shape index: {}]   ;;  %s2302_s10 = inlined_call_operand.hbm [shape: f32[1,128], index: 10, kind: input, shape index: {}]   ;;  %s2303_s11 = inlined_call_operand.vmem [shape: bf16[128,128], index: 11, kind: input, shape index: {}]   ;;  %s2304_s12 = inlined_call_operand.vmem [shape: bf16[16,128], index: 12, kind: output, shape index: {}]  }
   0x1   :  { %2307 = sst [smem:[#allocation20_spill]] %s2296_s4 }
   0x2   :  { %2308 = sst [smem:[#allocation21_spill]] %s2298_s6 }
   0x3   :  { %2309 = sst [smem:[#allocation22_spill]] %s2300_s8 }
   0x4   :  { %17 = vsyncpa [#allocation3], 0 }
   0x5   :  { %18 = vsyncpa [#allocation5], 0 }
   0x6   :  { %19 = vsyncpa [#allocation8], 0 }
   0x7   :  { %20 = vsyncpa [#allocation11], 0 }
   0x8   :  { %21 = vsyncpa [#allocation14], 0  ;;  %s1956_s21 = smov 0  }
   0x9 LB: > { %s1879_s22 = smov [#allocation4]   ;;  %s1962_s24 = sadd.s32 4294967295, %s1877_s21   ;;  %s1877_s21 = sphi %s1956_s21, %s27_s21  }
   0xa   : > { %s347_s23 = sshll.u32 %s1879_s22, 4  ;;  %p1272_p0 = scmp.ge.s32.totalorder %s1877_s21, 1  ;;  %s1967_s23 = int_to_ptr.vmem [resolvable:$true] %s347_s23 }
   0xb   : > { %p315_p1 = scmp.lt.s32.totalorder %s1877_s21, 3  ;;  %p2305_p2 = scmp.eq.s32.totalorder %s1962_s24, 0 }
   0xc   : > { %s1880_s26 = smov [#allocation7]   ;;  %s1881_s28 = smov [#allocation10]  }
   0xd   : > { %p1969_p3 = pnand %p1272_p0, %p315_p1  ;;  %s371_s27 = sshll.u32 %s1880_s26, 4  ;;  %s1975_s27 = int_to_ptr.vmem [resolvable:$true] %s371_s27 }
   0xe   : > { %s395_s29 = sshll.u32 %s1881_s28, 4  ;;  %s1882_s13 = smov [#allocation2]   ;;  %s1983_s29 = int_to_ptr.vmem [resolvable:$true] %s395_s29 }
   0xf   : > { %s2310_s25 = scalar_select %p1969_p3, 1, 0 }
  0x10   : > { %p1526_p4 = pneg %p1969_p3  ;;  %s333_s14 = sshll.u32 %s1882_s13, 4  ;;  %s1985_s14 = int_to_ptr.vmem [resolvable:$true] %s333_s14 }
  0x11   : > { %s2312_s4 = sld [smem:[#allocation20_spill]] }
  0x12   : > { %p1979_p5 = pnand %p2305_p2, %p1526_p4 }
  0x14   : > { %p1995_p7 = pneg %p1979_p5 }
  0x17   : > { %s1627_s17 = scalar_lea.hbm %s2312_s4, 16 }
  0x18   : > { %p1628_p6 = scmp.ne.s32.totalorder %s2312_s4, %s1627_s17  ;;  %p1634_p10 = scmp.lt.u32.totalorder %s1627_s17, %s2312_s4 }
  0x1a   : > { %p1630_p8 = pnand %p1995_p7, %p1628_p6 }
  0x1c   : > { %p1631_p9 = pneg %p1630_p8 }
  0x1e   : > { %p1636_p11 = pnand %p1634_p10, %p1631_p9 }
  0x20   : > { %1639 = shalt.err (!%p1636_p11)
}
  0x21   : > { %s1640_s28 = scalar_lea.vmem %s1967_s23, 16  ;;  %s1647_s13 = scalar_lea.vmem %s1967_s23, 32 }
  0x22   : > { %p1641_p12 = scmp.ne.s32.totalorder %s1967_s23, %s1640_s28  ;;  %p1648_p1 = scmp.lt.s32.totalorder %s1967_s23, %s1967_s23 }
  0x23   : > { %p1649_p4 = scmp.lt.s32.totalorder %s1647_s13, %s1640_s28 }
  0x24   : > { %p1643_p13 = pnand %p1641_p12, %p1995_p7 }
  0x25   : > { %p1650_p6 = por %p1649_p4, %p1648_p1 }
  0x26   : > { %p1644_p0 = pneg %p1643_p13 }
  0x28   : > { %p1651_p8 = pnand %p1650_p6, %p1644_p0 }
  0x2a   : > { %1654 = shalt.err (!%p1651_p8)
}
  0x2b   : > { %1532 = dma.hbm_to_vmem [thread:$0]  (!%p1979_p5), %s2312_s4, 16, %s1967_s23, [#allocation5]  }
  0x2c   : > { %s2314_s6 = sld [smem:[#allocation21_spill]] }
  0x32   : > { %s1655_s19 = scalar_lea.hbm %s2314_s6, 16 }
  0x33   : > { %p1656_p9 = scmp.ne.s32.totalorder %s2314_s6, %s1655_s19  ;;  %p1662_p12 = scmp.lt.u32.totalorder %s1655_s19, %s2314_s6 }
  0x35   : > { %p1658_p10 = pnand %p1656_p9, %p1995_p7 }
  0x37   : > { %p1659_p11 = pneg %p1658_p10 }
  0x39   : > { %p1664_p13 = pnand %p1662_p12, %p1659_p11 }
  0x3b   : > { %1667 = shalt.err (!%p1664_p13)
}
  0x3c   : > { %s1668_s23 = scalar_lea.vmem %s1975_s27, 16  ;;  %s1675_s15 = scalar_lea.vmem %s1975_s27, 32 }
  0x3d   : > { %p1669_p0 = scmp.ne.s32.totalorder %s1975_s27, %s1668_s23  ;;  %p1676_p6 = scmp.lt.s32.totalorder %s1975_s27, %s1975_s27 }
  0x3e   : > { %p1677_p8 = scmp.lt.s32.totalorder %s1675_s15, %s1668_s23 }
  0x3f   : > { %p1671_p1 = pnand %p1669_p0, %p1995_p7 }
  0x40   : > { %p1678_p9 = por %p1677_p8, %p1676_p6 }
  0x41   : > { %p1672_p4 = pneg %p1671_p1 }
  0x43   : > { %p1679_p10 = pnand %p1678_p9, %p1672_p4 }
  0x45   : > { %1682 = shalt.err (!%p1679_p10)
}
  0x46   : > { %1538 = dma.hbm_to_vmem [thread:$0]  (!%p1979_p5), %s2314_s6, 16, %s1975_s27, [#allocation8]  }
  0x47   : > { %s2315_s8 = sld [smem:[#allocation22_spill]] }
  0x4d   : > { %s1683_s22 = scalar_lea.hbm %s2315_s8, 16 }
  0x4e   : > { %p1684_p11 = scmp.ne.s32.totalorder %s2315_s8, %s1683_s22  ;;  %p1690_p0 = scmp.lt.u32.totalorder %s1683_s22, %s2315_s8 }
  0x50   : > { %p1686_p12 = pnand %p1684_p11, %p1995_p7 }
  0x52   : > { %p1687_p13 = pneg %p1686_p12 }
  0x54   : > { %p1692_p1 = pnand %p1690_p0, %p1687_p13 }
  0x56   : > { %1695 = shalt.err (!%p1692_p1)
}
  0x57   : > { %s1696_s27 = scalar_lea.vmem %s1983_s29, 16  ;;  %s1703_s15 = scalar_lea.vmem %s1983_s29, 32 }
  0x58   : > { %p1697_p4 = scmp.ne.s32.totalorder %s1983_s29, %s1696_s27  ;;  %p1704_p9 = scmp.lt.s32.totalorder %s1983_s29, %s1983_s29 }
  0x59   : > { %p1705_p10 = scmp.lt.s32.totalorder %s1703_s15, %s1696_s27 }
  0x5a   : > { %p1699_p6 = pnand %p1697_p4, %p1995_p7 }
  0x5b   : > { %p1706_p11 = por %p1705_p10, %p1704_p9 }
  0x5c   : > { %p1700_p8 = pneg %p1699_p6 }
  0x5e   : > { %p1707_p12 = pnand %p1706_p11, %p1700_p8 }
  0x60   : > { %1710 = shalt.err (!%p1707_p12)
}
  0x61   : > { %1544 = dma.hbm_to_vmem [thread:$0]  (!%p1979_p5), %s2315_s8, 16, %s1983_s29, [#allocation11]  }
  0x62   : > { %s1711_s22 = scalar_lea.hbm %s2295_s3, 1024 }
  0x63   : > { %p1712_p13 = scmp.ne.s32.totalorder %s2295_s3, %s1711_s22  ;;  %p1718_p4 = scmp.lt.u32.totalorder %s1711_s22, %s2295_s3 }
  0x65   : > { %p1714_p0 = pnand %p1712_p13, %p1995_p7 }
  0x67   : > { %p1715_p1 = pneg %p1714_p0 }
  0x69   : > { %p1720_p6 = pnand %p1718_p4, %p1715_p1 }
  0x6b   : > { %1723 = shalt.err (!%p1720_p6)
}
  0x6c   : > { %s1724_s29 = scalar_lea.vmem %s1985_s14, 1024  ;;  %p1732_p11 = scmp.lt.s32.totalorder %s1985_s14, %s1985_s14 }
  0x6d   : > { %p1725_p8 = scmp.ne.s32.totalorder %s1985_s14, %s1724_s29  ;;  %p1733_p12 = scmp.lt.s32.totalorder %s1724_s29, %s1724_s29 }
  0x6f   : > { %p1727_p9 = pnand %p1725_p8, %p1995_p7  ;;  %p1734_p13 = por %p1733_p12, %p1732_p11 }
  0x71   : > { %p1728_p10 = pneg %p1727_p9 }
  0x73   : > { %p1735_p0 = pnand %p1734_p13, %p1728_p10 }
  0x75   : > { %1738 = shalt.err (!%p1735_p0)
}
  0x76   : > { %s1883_s27 = smov 64   ;;  %s1884_s15 = smov 4  }
  0x77   : > { %1529 = dma.hbm_to_vmem [thread:$0]  (!%p1979_p5), %s2295_s3, 1024, %s1985_s14, [#allocation3], %s1883_s27, %s1883_s27, %s1884_s15  }
  0x78   : > { %s1885_s18 = smov [#allocation6]   ;;  %s1886_s22 = smov [#allocation9]  }
  0x79   : > { %s357_s19 = sshll.u32 %s1885_s18, 4  ;;  %s381_s26 = sshll.u32 %s1886_s22, 4  ;;  %s358_s19 = int_to_ptr.vmem [resolvable:$true] %s357_s19  ;;  %s382_s26 = int_to_ptr.vmem [resolvable:$true] %s381_s26 }
  0x7a   : > { %s1739_s23 = scalar_lea.hbm %s2297_s5, 1024 }
  0x7b   : > { %p1740_p1 = scmp.ne.s32.totalorder %s2297_s5, %s1739_s23  ;;  %p1746_p8 = scmp.lt.u32.totalorder %s1739_s23, %s2297_s5 }
  0x7d   : > { %p1742_p4 = pnand %p1740_p1, %p1995_p7 }
  0x7f   : > { %p1743_p6 = pneg %p1742_p4 }
  0x81   : > { %p1748_p9 = pnand %p1746_p8, %p1743_p6 }
  0x83   : > { %1751 = shalt.err (!%p1748_p9)
}
  0x84   : > { %s1752_s14 = scalar_lea.vmem %s358_s19, 1024  ;;  %p1760_p13 = scmp.lt.s32.totalorder %s358_s19, %s358_s19 }
  0x85   : > { %p1753_p10 = scmp.ne.s32.totalorder %s358_s19, %s1752_s14  ;;  %p1761_p0 = scmp.lt.s32.totalorder %s1752_s14, %s1752_s14 }
  0x87   : > { %p1755_p11 = pnand %p1753_p10, %p1995_p7  ;;  %p1762_p2 = por %p1761_p0, %p1760_p13 }
  0x89   : > { %p1756_p12 = pneg %p1755_p11 }
  0x8b   : > { %p1763_p3 = pnand %p1762_p2, %p1756_p12 }
  0x8d   : > { %1766 = shalt.err (!%p1763_p3)
}
  0x8e   : > { %1535 = dma.hbm_to_vmem [thread:$0]  (!%p1979_p5), %s2297_s5, 1024, %s358_s19, [#allocation5], %s1883_s27, %s1883_s27, %s1884_s15  }
  0x8f   : > { %s1767_s17 = scalar_lea.hbm %s2299_s7, 1024 }
  0x90   : > { %p1768_p2 = scmp.ne.s32.totalorder %s2299_s7, %s1767_s17  ;;  %p1774_p4 = scmp.lt.u32.totalorder %s1767_s17, %s2299_s7 }
  0x92   : > { %p1770_p3 = pnand %p1768_p2, %p1995_p7 }
  0x94   : > { %p1771_p1 = pneg %p1770_p3 }
  0x96   : > { %p1776_p6 = pnand %p1774_p4, %p1771_p1 }
  0x98   : > { %1779 = shalt.err (!%p1776_p6)
}
  0x99   : > { %s1780_s23 = scalar_lea.vmem %s382_s26, 1024  ;;  %p1788_p11 = scmp.lt.s32.totalorder %s382_s26, %s382_s26 }
  0x9a   : > { %p1781_p8 = scmp.ne.s32.totalorder %s382_s26, %s1780_s23  ;;  %p1789_p12 = scmp.lt.s32.totalorder %s1780_s23, %s1780_s23 }
  0x9c   : > { %p1783_p9 = pnand %p1781_p8, %p1995_p7  ;;  %p1790_p13 = por %p1789_p12, %p1788_p11 }
  0x9e   : > { %p1784_p10 = pneg %p1783_p9 }
  0xa0   : > { %p1791_p0 = pnand %p1790_p13, %p1784_p10 }
  0xa2   : > { %1794 = shalt.err (!%p1791_p0)
}
  0xa3   : > { %1541 = dma.hbm_to_vmem [thread:$0]  (!%p1979_p5), %s2299_s7, 1024, %s382_s26, [#allocation8], %s1883_s27, %s1883_s27, %s1884_s15  }
  0xa4   : > { %s1887_s14 = smov [#allocation12]   ;;  %s1888_s6 = smov [#allocation13]  }
  0xa5   : > { %s405_s4 = sshll.u32 %s1887_s14, 4  ;;  %s419_s8 = sshll.u32 %s1888_s6, 4  ;;  %s406_s4 = int_to_ptr.vmem [resolvable:$true] %s405_s4  ;;  %s420_s8 = int_to_ptr.vmem [resolvable:$true] %s419_s8 }
  0xa6   : > { %s1795_s18 = scalar_lea.hbm %s2301_s9, 1024 }
  0xa7   : > { %p1796_p2 = scmp.ne.s32.totalorder %s2301_s9, %s1795_s18  ;;  %p1802_p4 = scmp.lt.u32.totalorder %s1795_s18, %s2301_s9 }
  0xa9   : > { %p1798_p3 = pnand %p1796_p2, %p1995_p7 }
  0xab   : > { %p1799_p1 = pneg %p1798_p3 }
  0xad   : > { %p1804_p6 = pnand %p1802_p4, %p1799_p1 }
  0xaf   : > { %1807 = shalt.err (!%p1804_p6)
}
  0xb0   : > { %s1808_s26 = scalar_lea.vmem %s406_s4, 1024  ;;  %p1816_p11 = scmp.lt.s32.totalorder %s406_s4, %s406_s4 }
  0xb1   : > { %p1809_p8 = scmp.ne.s32.totalorder %s406_s4, %s1808_s26  ;;  %p1817_p12 = scmp.lt.s32.totalorder %s1808_s26, %s1808_s26 }
  0xb3   : > { %p1811_p9 = pnand %p1809_p8, %p1995_p7  ;;  %p1818_p13 = por %p1817_p12, %p1816_p11 }
  0xb5   : > { %p1812_p10 = pneg %p1811_p9 }
  0xb7   : > { %p1819_p0 = pnand %p1818_p13, %p1812_p10 }
  0xb9   : > { %1822 = shalt.err (!%p1819_p0)
}
  0xba   : > { %1547 = dma.hbm_to_vmem [thread:$0]  (!%p1979_p5), %s2301_s9, 1024, %s406_s4, [#allocation11], %s1883_s27, %s1883_s27, %s1884_s15  }
  0xbb   : > { %s1823_s16 = scalar_lea.hbm %s2302_s10, 16 }
  0xbc   : > { %p1824_p2 = scmp.ne.s32.totalorder %s2302_s10, %s1823_s16  ;;  %p1830_p4 = scmp.lt.u32.totalorder %s1823_s16, %s2302_s10 }
  0xbe   : > { %p1826_p3 = pnand %p1824_p2, %p1995_p7 }
  0xc0   : > { %p1827_p1 = pneg %p1826_p3 }
  0xc2   : > { %p1832_p6 = pnand %p1830_p4, %p1827_p1 }
  0xc4   : > { %1835 = shalt.err (!%p1832_p6)
}
  0xc5   : > { %s1836_s13 = scalar_lea.vmem %s420_s8, 16  ;;  %s1843_s27 = scalar_lea.vmem %s420_s8, 32 }
  0xc6   : > { %p1837_p8 = scmp.ne.s32.totalorder %s420_s8, %s1836_s13  ;;  %p1844_p11 = scmp.lt.s32.totalorder %s420_s8, %s420_s8 }
  0xc7   : > { %p1845_p12 = scmp.lt.s32.totalorder %s1843_s27, %s1836_s13 }
  0xc8   : > { %p1839_p9 = pnand %p1837_p8, %p1995_p7 }
  0xc9   : > { %p1846_p13 = por %p1845_p12, %p1844_p11 }
  0xca   : > { %p1840_p10 = pneg %p1839_p9 }
  0xcc   : > { %p1847_p0 = pnand %p1846_p13, %p1840_p10 }
  0xce   : > { %1850 = shalt.err (!%p1847_p0)
}
  0xcf   : > { %1550 = dma.hbm_to_vmem [thread:$0]  (!%p1979_p5), %s2302_s10, 16, %s420_s8, [#allocation14]  }
  0xd0   : > { %p2316_p2 = scmp.ne.s32.totalorder %s2310_s25, 0 }
  0xd1   : > { %p2317_p3 = scmp.eq.s32.totalorder (!%p2316_p2), %s1962_s24, 0 }
  0xd2   : > { %442 = sbr.rel (%p2316_p2) target bundleno = 1539 (0x603), region = 68 }
  0xd9   : > { %1856 = dma.done.wait (%p2317_p3), [#allocation3], 1024   ;;  %p2318_p7 = pmov %p2317_p3 }
  0xda   : > { %p2319_p1 = pmov %p2317_p3 }
  0xdb   : > { %1858 = vsyncadd (%p2318_p7), [#allocation3], 4294966272 }
  0xdc   : > { %1860 = dma.done.wait (%p2319_p1), [#allocation5], 1040   ;;  %p2320_p4 = pmov %p2319_p1 }
  0xdd   : > { %p2321_p6 = pmov %p2319_p1 }
  0xde   : > { %1862 = vsyncadd (%p2320_p4), [#allocation5], 4294966256 }
  0xdf   : > { %1864 = dma.done.wait (%p2321_p6), [#allocation8], 1040   ;;  %p2322_p5 = pmov %p2319_p1 }
  0xe0   : > { %p2323_p8 = pmov %p2319_p1 }
  0xe1   : > { %1866 = vsyncadd (%p2322_p5), [#allocation8], 4294966256 }
  0xe2   : > { %1868 = dma.done.wait (%p2323_p8), [#allocation11], 1040   ;;  %p2324_p9 = pmov %p2319_p1 }
  0xe3   : > { %p2325_p10 = pmov %p2319_p1 }
  0xe4   : > { %1870 = vsyncadd (%p2324_p9), [#allocation11], 4294966256 }
  0xe5   : > { %1872 = dma.done.wait (%p2325_p10), [#allocation14], 16   ;;  %p2326_p11 = pmov %p2319_p1 }
  0xe6   : > { %p510_p12 = scmp.lt.s32.totalorder %s1962_s24, 1  ;;  %v1889_v0 = vmov 0.0   ;;  %vm1890_vm0 = vmmov 0   ;;  %vm533_vm1 = vcmask 1041408   ;;  %v521_v1 = vld [vmem:[%s2293_s1] sm:$0x3] }
  0xe7   : > { %1874 = vsyncadd (%p2326_p11), [#allocation14], 4294967280  ;;  %1388 = vmatprep.subr.bf16.mxu0 %v1889_v0  ;;  %1390 = vmatprep.mubr.msk.bf16.mxu0 %vm1890_vm0, %v1889_v0  ;;  %v535_v3 = vsel %vm533_vm1, %v521_v1, 0  ;;  %v1587_v5 = vld [vmem:[#allocation2] sm:$0xff]   ;;  %vm529_vm2 = vcmask 31744   ;;  %v1588_v6 = vld [vmem:[#allocation2 + $0x8] sm:$0xff]  }
  0xe8   : > { %s2328_s24 = smov (!%p510_p12, %s1962_s24), 1  ;;  %1394 = vmatprep.subr.bf16.mxu1 %v1889_v0  ;;  %1410 = vmatprep.mubr.msk.bf16.mxu1 %vm1890_vm0, %v1889_v0  ;;  %v1589_v7 = vld [vmem:[#allocation2 + $0x10] sm:$0xff]   ;;  %v1590_v8 = vld [vmem:[#allocation2 + $0x18] sm:$0xff]   ;;  %v1591_v9 = vld [vmem:[#allocation2 + $0x20] sm:$0xff]  }
  0xe9   : > { %s1291_s25 = sshll.u32 %s2328_s24, 3  ;;  %1389 = vmatpush3.bf16.msra.mxu0 %v535_v3  ;;  %1395 = vmatpush3.bf16.msra.mxu1 %v1587_v5  ;;  %v1592_v10 = vld [vmem:[#allocation2 + $0x28] sm:$0xff]   ;;  %v1593_v11 = vld [vmem:[#allocation2 + $0x30] sm:$0xff]   ;;  %v1594_v12 = vld [vmem:[#allocation2 + $0x38] sm:$0xff]   ;;  %s1292_s26 = sshll.u32 %s2328_s24, 2 }
  0xea   : > { %s513_s8 = scalar_lea.vmem %s2292_s0, %s1291_s25  ;;  %1414 = vmatprep.subr.bf16.mxu0 %v1889_v0  ;;  %1396 = vmatprep.subr.bf16.mxu1 %v1889_v0  ;;  %v1595_v13 = vld [vmem:[#allocation6] sm:$0xff]   ;;  %v1596_v14 = vld [vmem:[#allocation6 + $0x8] sm:$0xff]   ;;  %v1597_v15 = vld [vmem:[#allocation6 + $0x10] sm:$0xff]   ;;  %s517_s14 = scalar_lea.vmem %s2304_s12, %s1292_s26 }
  0xeb   : > { %v519_v2 = vld [vmem:[%s513_s8] sm:$0xff]  ;;  %v1598_v16 = vld [vmem:[#allocation6 + $0x18] sm:$0xff]   ;;  %v1599_v17 = vld [vmem:[#allocation6 + $0x20] sm:$0xff]  }
  0xec   : > { %v520_v4 = vpack.c.bf16 %v519_v2, %v519_v2  ;;  %v1600_v18 = vld [vmem:[#allocation6 + $0x28] sm:$0xff]   ;;  %v1601_v26 = vld [vmem:[#allocation6 + $0x30] sm:$0xff]   ;;  %v1602_v27 = vld [vmem:[#allocation6 + $0x38] sm:$0xff]  }
  0xed   : > { %1397 = vmatpush3.bf16.msra.mxu1 %v1588_v6  ;;  %v1293_v19 = vld [vmem:[%s2294_s2] ss:$0 sm:$0xff]  ;;  %v1603_v28 = vld [vmem:[#allocation9] sm:$0xff]   ;;  %v1605_v30 = vld [vmem:[#allocation9 + $0x10] sm:$0xff]  }
  0xee   : > { %1391 = vmatmul.mubr.msk.bf16.vlgmr.msra.gmra.mrb[0].mxu0 %vm529_vm2, %v520_v4  ;;  %1398 = vmatprep.subr.bf16.mxu1 %v1889_v0  ;;  %v1604_v29 = vld [vmem:[#allocation9 + $0x8] sm:$0xff]   ;;  %v1606_v31 = vld [vmem:[#allocation9 + $0x18] sm:$0xff]   ;;  %v1607_v32 = vld [vmem:[#allocation9 + $0x20] sm:$0xff]  }
  0xef   : > { %1430 = vmatprep.mubr.msk.bf16.mxu0 %vm1890_vm0, %v1889_v0  ;;  %1415 = vmatpush3.bf16.msra.mxu0 %v1595_v13  ;;  %v1608_v33 = vld [vmem:[#allocation9 + $0x28] sm:$0xff]   ;;  %v1609_v34 = vld [vmem:[#allocation9 + $0x30] sm:$0xff]   ;;  %v1295_v35 = vld [vmem:[#allocation4] ss:$0 sm:$0xff] }
  0xf0   : > { %1416 = vmatprep.subr.bf16.mxu0 %v1889_v0  ;;  %v1610_v44 = vld [vmem:[#allocation9 + $0x38] sm:$0xff]   ;;  %v1611_v45 = vld [vmem:[#allocation12] sm:$0xff]   ;;  %v1612_v46 = vld [vmem:[#allocation12 + $0x8] sm:$0xff]  }
  0xf1   : > { %1399 = vmatpush3.bf16.msra.mxu1 %v1589_v7  ;;  %v1613_v47 = vld [vmem:[#allocation12 + $0x10] sm:$0xff]   ;;  %v1614_v48 = vld [vmem:[#allocation12 + $0x18] sm:$0xff]   ;;  %v1615_v49 = vld [vmem:[#allocation12 + $0x20] sm:$0xff]  }
  0xf2   : > { %1400 = vmatprep.subr.bf16.mxu1 %v1889_v0  ;;  %v1616_v50 = vld [vmem:[#allocation12 + $0x28] sm:$0xff]   ;;  %v1304_v51 = vld [vmem:[#allocation7] ss:$0 sm:$0xff]  ;;  %v1617_v58 = vld [vmem:[#allocation12 + $0x30] sm:$0xff]  }
  0xf3   : > { %1417 = vmatpush3.bf16.msra.mxu0 %v1596_v14  ;;  %v1618_v59 = vld [vmem:[#allocation12 + $0x38] sm:$0xff]   ;;  %v1619_v60 = vld [vmem:[%s2303_s11] sm:$0xff]   ;;  %v1622_v63 = vld [vmem:[%s2303_s11 + $0x18] sm:$0xff]  }
  0xf4   : > { %1418 = vmatprep.subr.bf16.mxu0 %v1889_v0  ;;  %v1620_v61 = vld [vmem:[%s2303_s11 + $0x8] sm:$0xff]   ;;  %v1621_v62 = vld [vmem:[%s2303_s11 + $0x10] sm:$0xff]   ;;  %v1623_v1 = vld [vmem:[%s2303_s11 + $0x20] sm:$0xff]  }
  0xf5   : > { %1401 = vmatpush3.bf16.msra.mxu1 %v1590_v8  ;;  %v1624_v2 = vld [vmem:[%s2303_s11 + $0x28] sm:$0xff]   ;;  %v1625_v3 = vld [vmem:[%s2303_s11 + $0x30] sm:$0xff]   ;;  %v1626_v13 = vld [vmem:[%s2303_s11 + $0x38] sm:$0xff]  }
  0xf6   : > { %1402 = vmatprep.subr.bf16.mxu1 %v1889_v0  ;;  %v1313_v4 = vld [vmem:[#allocation10] ss:$0 sm:$0xff]  ;;  %v1322_v14 = vld [vmem:[#allocation13] ss:$0 sm:$0xff] }
  0xf7   : > { %1419 = vmatpush3.bf16.msra.mxu0 %v1597_v15 }
  0xf8   : > { %1420 = vmatprep.subr.bf16.mxu0 %v1889_v0 }
  0xf9   : > { %1403 = vmatpush3.bf16.msra.mxu1 %v1591_v9 }
  0xfa   : > { %1404 = vmatprep.subr.bf16.mxu1 %v1889_v0 }
  0xfb   : > { %1421 = vmatpush3.bf16.msra.mxu0 %v1598_v16 }
  0xfc   : > { %1422 = vmatprep.subr.bf16.mxu0 %v1889_v0 }
  0xfd   : > { %1405 = vmatpush3.bf16.msra.mxu1 %v1592_v10 }
  0xfe   : > { %1406 = vmatprep.subr.bf16.mxu1 %v1889_v0 }
  0xff   : > { %1423 = vmatpush3.bf16.msra.mxu0 %v1599_v17 }
 0x100   : > { %1424 = vmatprep.subr.bf16.mxu0 %v1889_v0 }
 0x101   : > { %1407 = vmatpush3.bf16.msra.mxu1 %v1593_v11 }
 0x102   : > { %1408 = vmatprep.subr.bf16.mxu1 %v1889_v0 }
 0x103   : > { %1425 = vmatpush3.bf16.msra.mxu0 %v1600_v18 }
 0x104   : > { %1426 = vmatprep.subr.bf16.mxu0 %v1889_v0 }
 0x105   : > { %1409 = vmatpush3.bf16.msra.mxu1 %v1594_v12 }
 0x106   : > { %1434 = vmatprep.subr.bf16.mxu1 %v1889_v0 }
 0x107   : > { %1427 = vmatpush3.bf16.msra.mxu0 %v1601_v26 }
 0x108   : > { %1428 = vmatprep.subr.bf16.mxu0 %v1889_v0 }
 0x10b   : > { %1429 = vmatpush3.bf16.msra.mxu0 %v1602_v27 }
 0x10c   : > { %1454 = vmatprep.subr.bf16.mxu0 %v1889_v0 }
 0x1c1   : > { %v571_v20 = vpop.f32.mrb[0].mxu0 }
 0x1c2   : > { %v572_v21 = vadd.f32 %v1293_v19, %v571_v20  ;;  %v1392_v22 = vpop.f32.mrb[1].mxu0 }
 0x1c3   : > { %v574_v23 = vpop.f32.mrb[2].mxu0 }
 0x1c4   : > { %v611_v24 = vpack.c.bf16 %v572_v21, %v572_v21  ;;  %v1393_v25 = vpop.f32.mrb[3].mxu0 }
 0x1c6   : > { %1411 = vmatmul.mubr.bf16.vlgmr.msra.gmra.mrb[0].mxu1 %v611_v24 }
 0x1c7   : > { %1450 = vmatprep.mubr.msk.bf16.mxu1 %vm1890_vm0, %v1889_v0  ;;  %1435 = vmatpush3.bf16.msra.mxu1 %v1603_v28 }
 0x1c8   : > { %1436 = vmatprep.subr.bf16.mxu1 %v1889_v0 }
 0x1cb   : > { %1437 = vmatpush3.bf16.msra.mxu1 %v1604_v29 }
 0x1cc   : > { %1438 = vmatprep.subr.bf16.mxu1 %v1889_v0 }
 0x1cf   : > { %1439 = vmatpush3.bf16.msra.mxu1 %v1605_v30 }
 0x1d0   : > { %1440 = vmatprep.subr.bf16.mxu1 %v1889_v0 }
 0x1d3   : > { %1441 = vmatpush3.bf16.msra.mxu1 %v1606_v31 }
 0x1d4   : > { %1442 = vmatprep.subr.bf16.mxu1 %v1889_v0 }
 0x1d7   : > { %1443 = vmatpush3.bf16.msra.mxu1 %v1607_v32 }
 0x1d8   : > { %1444 = vmatprep.subr.bf16.mxu1 %v1889_v0 }
 0x1db   : > { %1445 = vmatpush3.bf16.msra.mxu1 %v1608_v33 }
 0x1dc   : > { %1446 = vmatprep.subr.bf16.mxu1 %v1889_v0 }
 0x1df   : > { %1447 = vmatpush3.bf16.msra.mxu1 %v1609_v34 }
 0x1e0   : > { %1448 = vmatprep.subr.bf16.mxu1 %v1889_v0 }
 0x1e3   : > { %1449 = vmatpush3.bf16.msra.mxu1 %v1610_v44 }
 0x1e4   : > { %1474 = vmatprep.subr.bf16.mxu1 %v1889_v0 }
 0x299   : > { %v700_v36 = vpop.f32.mrb[0].mxu1 }
 0x29a   : > { %v701_v37 = vadd.f32 %v1295_v35, %v700_v36  ;;  %v1412_v38 = vpop.f32.mrb[1].mxu1 }
 0x29b   : > { %v703_v39 = vpop.f32.mrb[2].mxu1 }
 0x29c   : > { %vm706_vm3 = vcmp.gt.f32.partialorder %v701_v37, 0.0  ;;  %v707_v40 = vmul.f32 0.2, %v701_v37  ;;  %v1413_v41 = vpop.f32.mrb[3].mxu1 }
 0x29e   : > { %v708_v42 = vsel %vm706_vm3, %v701_v37, %v707_v40 }
 0x29f   : > { %v709_v43 = vpack.c.bf16 %v708_v42, %v708_v42 }
 0x2a1   : > { %1431 = vmatmul.mubr.bf16.vlgmr.msra.gmra.mrb[4].mxu0 %v709_v43 }
 0x2a2   : > { %1470 = vmatprep.mubr.msk.bf16.mxu0 %vm1890_vm0, %v1889_v0  ;;  %1455 = vmatpush3.bf16.msra.mxu0 %v1611_v45 }
 0x2a3   : > { %1456 = vmatprep.subr.bf16.mxu0 %v1889_v0 }
 0x2a6   : > { %1457 = vmatpush3.bf16.msra.mxu0 %v1612_v46 }
 0x2a7   : > { %1458 = vmatprep.subr.bf16.mxu0 %v1889_v0 }
 0x2aa   : > { %1459 = vmatpush3.bf16.msra.mxu0 %v1613_v47 }
 0x2ab   : > { %1460 = vmatprep.subr.bf16.mxu0 %v1889_v0 }
 0x2ae   : > { %1461 = vmatpush3.bf16.msra.mxu0 %v1614_v48 }
 0x2af   : > { %1462 = vmatprep.subr.bf16.mxu0 %v1889_v0 }
 0x2b2   : > { %1463 = vmatpush3.bf16.msra.mxu0 %v1615_v49 }
 0x2b3   : > { %1464 = vmatprep.subr.bf16.mxu0 %v1889_v0 }
 0x2b6   : > { %1465 = vmatpush3.bf16.msra.mxu0 %v1616_v50 }
 0x2b7   : > { %1466 = vmatprep.subr.bf16.mxu0 %v1889_v0 }
 0x2ba   : > { %1467 = vmatpush3.bf16.msra.mxu0 %v1617_v58 }
 0x2bb   : > { %1468 = vmatprep.subr.bf16.mxu0 %v1889_v0 }
 0x2be   : > { %1469 = vmatpush3.bf16.msra.mxu0 %v1618_v59 }
 0x374   : > { %v798_v52 = vpop.f32.mrb[4].mxu0 }
 0x375   : > { %v799_v53 = vadd.f32 %v1304_v51, %v798_v52  ;;  %v1432_v54 = vpop.f32.mrb[5].mxu0 }
 0x376   : > { %v801_v55 = vpop.f32.mrb[6].mxu0 }
 0x377   : > { %v838_v56 = vpack.c.bf16 %v799_v53, %v799_v53  ;;  %v1433_v57 = vpop.f32.mrb[7].mxu0 }
 0x379   : > { %1451 = vmatmul.mubr.bf16.vlgmr.msra.gmra.mrb[4].mxu1 %v838_v56 }
 0x37a   : > { %1490 = vmatprep.mubr.msk.bf16.mxu1 %vm1890_vm0, %v1889_v0  ;;  %1475 = vmatpush3.bf16.msra.mxu1 %v1619_v60 }
 0x37b   : > { %1476 = vmatprep.subr.bf16.mxu1 %v1889_v0 }
 0x37e   : > { %1477 = vmatpush3.bf16.msra.mxu1 %v1620_v61 }
 0x37f   : > { %1478 = vmatprep.subr.bf16.mxu1 %v1889_v0 }
 0x382   : > { %1479 = vmatpush3.bf16.msra.mxu1 %v1621_v62 }
 0x383   : > { %1480 = vmatprep.subr.bf16.mxu1 %v1889_v0 }
 0x386   : > { %1481 = vmatpush3.bf16.msra.mxu1 %v1622_v63 }
 0x387   : > { %1482 = vmatprep.subr.bf16.mxu1 %v1889_v0 }
 0x38a   : > { %1483 = vmatpush3.bf16.msra.mxu1 %v1623_v1 }
 0x38b   : > { %1484 = vmatprep.subr.bf16.mxu1 %v1889_v0 }
 0x38e   : > { %1485 = vmatpush3.bf16.msra.mxu1 %v1624_v2 }
 0x38f   : > { %1486 = vmatprep.subr.bf16.mxu1 %v1889_v0 }
 0x392   : > { %1487 = vmatpush3.bf16.msra.mxu1 %v1625_v3 }
 0x393   : > { %1488 = vmatprep.subr.bf16.mxu1 %v1889_v0 }
 0x396   : > { %1489 = vmatpush3.bf16.msra.mxu1 %v1626_v13 }
 0x44c   : > { %v927_v5 = vpop.f32.mrb[4].mxu1 }
 0x44d   : > { %v928_v6 = vadd.f32 %v1313_v4, %v927_v5  ;;  %v1452_v7 = vpop.f32.mrb[5].mxu1 }
 0x44e   : > { %v930_v8 = vpop.f32.mrb[6].mxu1 }
 0x44f   : > { %vm933_vm4 = vcmp.gt.f32.partialorder %v928_v6, 0.0  ;;  %v934_v9 = vmul.f32 0.2, %v928_v6  ;;  %v1453_v10 = vpop.f32.mrb[7].mxu1 }
 0x451   : > { %v935_v11 = vsel %vm933_vm4, %v928_v6, %v934_v9 }
 0x452   : > { %v936_v12 = vpack.c.bf16 %v935_v11, %v935_v11 }
 0x454   : > { %1471 = vmatmul.mubr.bf16.vlgmr.msra.gmra.mrb[8].mxu0 %v936_v12 }
 0x527   : > { %v1025_v15 = vpop.f32.mrb[8].mxu0 }
 0x528   : > { %v1026_v0 = vadd.f32 %v1322_v14, %v1025_v15  ;;  %v1472_v16 = vpop.f32.mrb[9].mxu0 }
 0x529   : > { %v1028_v17 = vpop.f32.mrb[10].mxu0 }
 0x52a   : > { %v1031_v18 = vpack.c.bf16 %v1026_v0, %v1026_v0  ;;  %v1473_v19 = vpop.f32.mrb[11].mxu0 }
 0x52c   : > { %1491 = vmatmul.mubr.bf16.vlgmr.msra.gmra.mrb[8].mxu1 %v1031_v18 }
 0x5ff   : > { %v1130_v20 = vpop.f32.mrb[8].mxu1 }
 0x600   : > { %v1136_v21 = vpack.c.bf16 %v1130_v20, %v1130_v20  ;;  %v1492_v22 = vpop.f32.mrb[9].mxu1 }
 0x601   : > { %v1133_v23 = vpop.f32.mrb[10].mxu1 }
 0x602   : > { %1137 = vst [vmem:[%s517_s14] sm:$0xf] %v1136_v21  ;;  %v1493_v24 = vpop.f32.mrb[11].mxu1 }
 0x603 PF: > { %s27_s21 = sadd.s32 1, %s1877_s21  }
 0x604   : > { %p24_p13 = scmp.ge.s32.totalorder %s27_s21, 4  }
 0x606   :  { %26 = sbr.rel (!%p24_p13) target bundleno = 9 (0x9), region = 131 }
 0x60d   :  { %1157 = vsyncpa [#allocation3], 1 }
 0x60e   :  { %1159 = vsyncpa [#allocation3 + $0x1], 1 }
 0x60f   :  { %1160 = vsyncpa [#allocation5], 1 }
 0x610   :  { %1161 = vsyncpa [#allocation8], 1 }
 0x611   :  { %1162 = vsyncpa [#allocation11], 1 }
 0x612   :  { %1163 = vsyncpa [#allocation14], 1 }

</bundles_post_ra>
